<compile_context>
chip_gen: v5e
topology: v5e:2x2
jax: 0.10.0
libtpu: 0.0.40
codegen_flags: <defaults>
</compile_context>

<pallas_src>
import functools

import jax
import jax.numpy as jnp
import numpy as np
from jax.experimental import pallas as pl
from jax.experimental.pallas import tpu as pltpu


def _round_up(x, m):
    return (x + m - 1) // m * m


def output_block_kernel(dist_ref, msg_ref, tgt_ref,
                        wdist_ref, wl_ref, bl_ref, wout_ref,
                        out_ref, acc_ref, *, num_layers, activation):
    """One edge tile per grid step; node accumulator persists in VMEM scratch."""
    step = pl.program_id(0)

    @pl.when(step == 0)
    def _init():
        acc_ref[...] = jnp.zeros_like(acc_ref)

    # linear_distance (fused with the elementwise gate):
    #   d  = dist_tile @ W_dist            [tile_e, H]   (tiny K; kept fused)
    #   tm = d * message_tile              [tile_e, H]   f32 elementwise
    d = jnp.dot(dist_ref[...], wdist_ref[...],
                preferred_element_type=jnp.float32)
    tm = d * msg_ref[...]

    # scatter_add_(0, target, tm) as a one-hot matmul on the MXU.
    # onehot is exactly representable in bf16; accumulate in f32.
    n_nodes_pad = acc_ref.shape[0]
    tile_e = tm.shape[0]
    row_ids = jax.lax.broadcasted_iota(jnp.int32, (n_nodes_pad, tile_e), 0)
    onehot = (row_ids == tgt_ref[...]).astype(jnp.bfloat16)      # [N_pad, tile_e]
    acc_ref[...] += jnp.dot(onehot, tm.astype(jnp.bfloat16),
                            preferred_element_type=jnp.float32)  # [N_pad, H]

    # Finalize (MLP stack + output projection) once, after the last edge tile.
    @pl.when(step == pl.num_programs(0) - 1)
    def _finalize():
        node = acc_ref[...]                                      # [N_pad, H] f32
        for l in range(num_layers):                              # static unroll
            w = wl_ref[l].astype(jnp.bfloat16)                   # [H, H]
            b = bl_ref[l:l + 1, :]                               # [1, H]
            node = jnp.dot(node.astype(jnp.bfloat16), w,
                           preferred_element_type=jnp.float32) + b
            if activation is not None:
                node = activation(node)
        out_ref[...] = jnp.dot(node.astype(jnp.bfloat16),
                               wout_ref[...].astype(jnp.bfloat16),
                               preferred_element_type=jnp.float32)


def output_block(distance_representation, message, edge_index, num_nodes,
                 w_dist, w_layers, b_layers, w_out,
                 *, tile_e=512, activation=None):
    """Pallas wrapper mirroring OutputBlock.forward.

    Weights are stored pre-transposed as [in, out] so the kernel computes
    x @ W (+ b), matching nn.Linear(x) = x W^T + b.
    """
    E, R = distance_representation.shape
    H = message.shape[1]
    L = int(w_layers.shape[0])
    out_dim = w_out.shape[1]

    # ---- padding for TPU tiling -------------------------------------------
    # Edge tile must be a multiple of 128 so the [1, tile_e] target block is
    # lane-aligned; edges are padded up to a whole number of tiles.
    tile_e = max(128, _round_up(int(tile_e), 128))
    e_pad = _round_up(max(E, 1), tile_e)
    n_pad = _round_up(int(num_nodes), 8)          # sublane-aligned node rows
    r_pad = _round_up(R, 8)                       # >=8 sublanes for the K=R matmul
    out_pad = _round_up(out_dim, 128)             # lane-dense (unmasked) stores

    f32 = jnp.float32
    dist_p = jnp.zeros((e_pad, r_pad), f32).at[:E, :R].set(
        distance_representation.astype(f32))
    msg_p = jnp.zeros((e_pad, H), f32).at[:E, :].set(message.astype(f32))
    # Padded edges get target -1 -> never matches a node row (and their
    # message/dist rows are zero anyway).
    tgt_p = jnp.full((1, e_pad), -1, jnp.int32).at[0, :E].set(
        edge_index[1].astype(jnp.int32))
    wdist_p = jnp.zeros((r_pad, H), f32).at[:R, :].set(w_dist.astype(f32))
    wout_p = jnp.zeros((H, out_pad), f32).at[:, :out_dim].set(w_out.astype(f32))
    wl = w_layers.astype(f32)
    bl = b_layers.astype(f32)
    # NOTE: at production scale, message / weights can be stored bf16 in HBM
    # to halve the dominant streaming bytes; kept f32 here for precision.

    n_edge_tiles = e_pad // tile_e

    kernel = functools.partial(output_block_kernel,
                               num_layers=L, activation=activation)

    grid_spec = pltpu.PrefetchScalarGridSpec(
        num_scalar_prefetch=0,
        grid=(n_edge_tiles,),
        in_specs=[
            pl.BlockSpec((tile_e, r_pad), lambda k: (k, 0)),   # distance tile
            pl.BlockSpec((tile_e, H), lambda k: (k, 0)),       # message tile
            pl.BlockSpec((1, tile_e), lambda k: (0, k)),       # target ids tile
            pl.BlockSpec((r_pad, H), lambda k: (0, 0)),        # W_dist (resident)
            pl.BlockSpec((L, H, H), lambda k: (0, 0, 0)),      # layer weights
            pl.BlockSpec((L, H), lambda k: (0, 0)),            # layer biases
            pl.BlockSpec((H, out_pad), lambda k: (0, 0)),      # W_out (padded)
        ],
        out_specs=pl.BlockSpec((n_pad, out_pad), lambda k: (0, 0)),
        scratch_shapes=[pltpu.VMEM((n_pad, H), jnp.float32)],  # node accumulator
    )

    flops = (2 * e_pad * r_pad * H                 # distance matmul
             + 2 * e_pad * n_pad * H               # one-hot scatter matmul
             + 2 * L * n_pad * H * H               # MLP stack
             + 2 * n_pad * H * out_pad)            # output projection
    bytes_accessed = 4 * (e_pad * (r_pad + H + 1) + n_pad * out_pad
                          + r_pad * H + L * H * (H + 1) + H * out_pad)

    out_padded = pl.pallas_call(
        kernel,
        out_shape=jax.ShapeDtypeStruct((n_pad, out_pad), jnp.float32),
        grid_spec=grid_spec,
        compiler_params=pltpu.CompilerParams(
            dimension_semantics=("arbitrary",),        # edge axis is a reduction
            vmem_limit_bytes=48 * 1024 * 1024,         # fits v7x's 64 MiB VMEM
        ),
        cost_estimate=pl.CostEstimate(flops=flops, transcendentals=0,
                                      bytes_accessed=bytes_accessed),
    )(dist_p, msg_p, tgt_p, wdist_p, wl, bl, wout_p)

    return out_padded[:num_nodes, :out_dim]


def orthogonal(key, shape):
    """Deterministic orthogonal init (a la torch.nn.init.orthogonal_)."""
    rows, cols = shape
    n = max(rows, cols)
    a = jax.random.normal(key, (n, n), dtype=jnp.float32)
    q, r = jnp.linalg.qr(a)
    q = q * jnp.sign(jnp.diag(r))[None, :]
    return q[:rows, :cols]


def reference(distance_representation, message, edge_index, num_nodes,
              w_dist, w_layers, b_layers, w_out, activation=None):
    """Pure-JAX f32 reference of OutputBlock.forward."""
    d = distance_representation @ w_dist
    tm = d * message
    target = edge_index[1]
    node = jnp.zeros((num_nodes, tm.shape[1]), jnp.float32).at[target].add(tm)
    for l in range(w_layers.shape[0]):
        node = node @ w_layers[l] + b_layers[l]
        if activation is not None:
            node = activation(node)
    return node @ w_out


if __name__ == "__main__":
    # E edges, N nodes, R radial basis, H hidden, L linear layers.
    # E=200 with TILE_E=128 -> 2 edge-grid steps (exercises padding + accumulate).
    E, N, R, H, OUT_DIM, L = 200, 64, 6, 32, 8, 2
    TILE_E = 128

    key = jax.random.PRNGKey(0)
    ks = jax.random.split(key, 8)

    distance_representation = jax.random.normal(ks[0], (E, R), dtype=jnp.float32)
    message = jax.random.normal(ks[1], (E, H), dtype=jnp.float32)
    src = jax.random.randint(ks[2], (E,), 0, N, dtype=jnp.int32)
    tgt = jax.random.randint(ks[3], (E,), 0, N, dtype=jnp.int32)
    edge_index = jnp.stack([src, tgt])                                    # [2, E]

    # Parameters (orthogonal like reset_parameters), stored as [in, out].
    w_dist = orthogonal(ks[4], (H, R)).T                                  # [R, H]
    layer_keys = jax.random.split(ks[5], L)
    w_layers = jnp.stack([orthogonal(k, (H, H)).T for k in layer_keys])   # [L, H, H]
    # Non-zero biases so the bias-add path is exercised (reset_parameters()
    # zeroes them, but forward() must handle arbitrary values).
    b_layers = 0.1 * jax.random.normal(ks[6], (L, H), dtype=jnp.float32)  # [L, H]
    w_out = orthogonal(ks[7], (OUT_DIM, H)).T                             # [H, out]

    out = output_block(distance_representation, message, edge_index, N,
                       w_dist, w_layers, b_layers, w_out,
                       tile_e=TILE_E, activation=None)
    out = jax.block_until_ready(out)

    ref = reference(distance_representation, message, edge_index, N,
                    w_dist, w_layers, b_layers, w_out, activation=None)

    out_np, ref_np = np.asarray(out), np.asarray(ref)
    # bf16 MXU operands with f32 accumulation -> looser elementwise tolerance,
    # backed by a tight relative-Frobenius check (real bugs give O(1) errors).
    np.testing.assert_allclose(out_np, ref_np, rtol=5e-2, atol=5e-2)
    rel = np.linalg.norm(out_np - ref_np) / np.linalg.norm(ref_np)
    assert rel < 2e-2, f"relative error too large: {rel}"
    print("KERNEL_OK")
</pallas_src>

<mosaic_0001>
module attributes {stable_mosaic.version = 11 : i64} {
  func.func @output_block_kernel(%arg0: i32, %arg1: memref<128x8xf32, #tpu.memory_space<vmem>>, %arg2: memref<128x32xf32, #tpu.memory_space<vmem>>, %arg3: memref<1x128xi32, #tpu.memory_space<vmem>>, %arg4: memref<8x32xf32, #tpu.memory_space<vmem>>, %arg5: memref<2x32x32xf32, #tpu.memory_space<vmem>>, %arg6: memref<2x32xf32, #tpu.memory_space<vmem>>, %arg7: memref<32x128xf32, #tpu.memory_space<vmem>>, %arg8: memref<64x128xf32, #tpu.memory_space<vmem>>, %arg9: memref<64x32xf32, #tpu.memory_space<vmem>>) attributes {dimension_semantics = [#tpu.dimension_semantics<arbitrary>], iteration_bounds = array<i64: 2>, scalar_prefetch = 0 : i64, scratch_operands = 1 : i64, tpu.core_type = #tpu.core_type<tc>, window_params = [{transform_indices = @transform_0, window_bounds = array<i64: 128, 8>}, {transform_indices = @transform_1, window_bounds = array<i64: 128, 32>}, {transform_indices = @transform_2, window_bounds = array<i64: 1, 128>}, {pipeline_mode = #tpu.pipeline_mode<synchronous>, transform_indices = @transform_3, window_bounds = array<i64: 8, 32>}, {pipeline_mode = #tpu.pipeline_mode<synchronous>, transform_indices = @transform_4, window_bounds = array<i64: 2, 32, 32>}, {pipeline_mode = #tpu.pipeline_mode<synchronous>, transform_indices = @transform_5, window_bounds = array<i64: 2, 32>}, {pipeline_mode = #tpu.pipeline_mode<synchronous>, transform_indices = @transform_6, window_bounds = array<i64: 32, 128>}, {pipeline_mode = #tpu.pipeline_mode<synchronous>, transform_indices = @transform_7, window_bounds = array<i64: 64, 128>}]} {
    %c0_i32 = arith.constant 0 : i32
    %0 = arith.cmpi eq, %arg0, %c0_i32 : i32
    %1 = arith.extui %0 : i1 to i32
    %c0_i32_0 = arith.constant 0 : i32
    %2 = arith.cmpi ne, %1, %c0_i32_0 : i32
    scf.if %2 {
      %cst_14 = arith.constant 0.000000e+00 : f32
      %23 = vector.broadcast %cst_14 : f32 to vector<64x32xf32>
      %c0_15 = arith.constant 0 : index
      %c0_16 = arith.constant 0 : index
      %24 = vector.load %arg9[%c0_15, %c0_16] : memref<64x32xf32, #tpu.memory_space<vmem>>, vector<64x32xf32>
      tpu.vector_store %arg9[%c0_15, %c0_16], %23 {strides = array<i32>} : memref<64x32xf32, #tpu.memory_space<vmem>>, vector<64x32xf32>,
    } else {
    }
    %c0 = arith.constant 0 : index
    %c0_1 = arith.constant 0 : index
    %3 = vector.load %arg1[%c0, %c0_1] : memref<128x8xf32, #tpu.memory_space<vmem>>, vector<128x8xf32>
    %c0_2 = arith.constant 0 : index
    %c0_3 = arith.constant 0 : index
    %4 = vector.load %arg4[%c0_2, %c0_3] : memref<8x32xf32, #tpu.memory_space<vmem>>, vector<8x32xf32>
    %cst = arith.constant dense<0.000000e+00> : vector<128x32xf32>
    %5 = tpu.matmul %3, %4, %cst {dimension_numbers = #tpu.dot_dimension_numbers<[1], [0], [0], [1], [0, 0, 1, 1], [], []>} : vector<128x8xf32>, vector<8x32xf32>, vector<128x32xf32> -> vector<128x32xf32>
    %c0_4 = arith.constant 0 : index
    %c0_5 = arith.constant 0 : index
    %6 = vector.load %arg2[%c0_4, %c0_5] : memref<128x32xf32, #tpu.memory_space<vmem>>, vector<128x32xf32>
    %7 = arith.mulf %5, %6 : vector<128x32xf32>
    %8 = tpu.iota {dimensions = array<i32: 0>} : vector<64x128xi32>
    %c0_6 = arith.constant 0 : index
    %c0_7 = arith.constant 0 : index
    %9 = vector.load %arg3[%c0_6, %c0_7] : memref<1x128xi32, #tpu.memory_space<vmem>>, vector<1x128xi32>
    %10 = vector.broadcast %9 : vector<1x128xi32> to vector<64x128xi32>
    %11 = arith.cmpi eq, %8, %10 : vector<64x128xi32>
    %12 = arith.extui %11 : vector<64x128xi1> to vector<64x128xi32>
    %13 = arith.sitofp %12 : vector<64x128xi32> to vector<64x128xf32>
    %14 = arith.truncf %13 : vector<64x128xf32> to vector<64x128xbf16>
    %c0_8 = arith.constant 0 : index
    %c0_9 = arith.constant 0 : index
    %15 = vector.load %arg9[%c0_8, %c0_9] : memref<64x32xf32, #tpu.memory_space<vmem>>, vector<64x32xf32>
    %16 = arith.truncf %7 : vector<128x32xf32> to vector<128x32xbf16>
    %cst_10 = arith.constant dense<0.000000e+00> : vector<64x32xf32>
    %17 = tpu.matmul %14, %16, %cst_10 {dimension_numbers = #tpu.dot_dimension_numbers<[1], [0], [0], [1], [0, 0, 1, 1], [], []>} : vector<64x128xbf16>, vector<128x32xbf16>, vector<64x32xf32> -> vector<64x32xf32>
    %18 = arith.addf %15, %17 : vector<64x32xf32>
    %c0_11 = arith.constant 0 : index
    %c0_12 = arith.constant 0 : index
    %19 = vector.load %arg9[%c0_11, %c0_12] : memref<64x32xf32, #tpu.memory_space<vmem>>, vector<64x32xf32>
    tpu.vector_store %arg9[%c0_11, %c0_12], %18 {strides = array<i32>} : memref<64x32xf32, #tpu.memory_space<vmem>>, vector<64x32xf32>,
    %c1_i32 = arith.constant 1 : i32
    %20 = arith.cmpi eq, %arg0, %c1_i32 : i32
    %21 = arith.extui %20 : i1 to i32
    %c0_i32_13 = arith.constant 0 : i32
    %22 = arith.cmpi ne, %21, %c0_i32_13 : i32
    scf.if %22 {
      %c0_14 = arith.constant 0 : index
      %c0_15 = arith.constant 0 : index
      %23 = vector.load %arg9[%c0_14, %c0_15] : memref<64x32xf32, #tpu.memory_space<vmem>>, vector<64x32xf32>
      %c0_16 = arith.constant 0 : index
      %c0_17 = arith.constant 0 : index
      %c0_18 = arith.constant 0 : index
      %24 = vector.load %arg5[%c0_16, %c0_17, %c0_18] : memref<2x32x32xf32, #tpu.memory_space<vmem>>, vector<1x32x32xf32>
      %25 = vector.shape_cast %24 : vector<1x32x32xf32> to vector<32x32xf32>
      %26 = arith.truncf %25 : vector<32x32xf32> to vector<32x32xbf16>
      %c0_19 = arith.constant 0 : index
      %c0_20 = arith.constant 0 : index
      %27 = vector.load %arg6[%c0_19, %c0_20] : memref<2x32xf32, #tpu.memory_space<vmem>>, vector<1x32xf32>
      %28 = arith.truncf %23 : vector<64x32xf32> to vector<64x32xbf16>
      %cst_21 = arith.constant dense<0.000000e+00> : vector<64x32xf32>
      %29 = tpu.matmul %28, %26, %cst_21 {dimension_numbers = #tpu.dot_dimension_numbers<[1], [0], [0], [1], [0, 0, 1, 1], [], []>} : vector<64x32xbf16>, vector<32x32xbf16>, vector<64x32xf32> -> vector<64x32xf32>
      %30 = vector.broadcast %27 : vector<1x32xf32> to vector<64x32xf32>
      %31 = arith.addf %29, %30 : vector<64x32xf32>
      %c1 = arith.constant 1 : index
      %c0_22 = arith.constant 0 : index
      %c0_23 = arith.constant 0 : index
      %32 = vector.load %arg5[%c1, %c0_22, %c0_23] : memref<2x32x32xf32, #tpu.memory_space<vmem>>, vector<1x32x32xf32>
      %33 = vector.shape_cast %32 : vector<1x32x32xf32> to vector<32x32xf32>
      %34 = arith.truncf %33 : vector<32x32xf32> to vector<32x32xbf16>
      %c1_24 = arith.constant 1 : index
      %c0_25 = arith.constant 0 : index
      %35 = vector.load %arg6[%c1_24, %c0_25] : memref<2x32xf32, #tpu.memory_space<vmem>>, vector<1x32xf32>
      %36 = arith.truncf %31 : vector<64x32xf32> to vector<64x32xbf16>
      %cst_26 = arith.constant dense<0.000000e+00> : vector<64x32xf32>
      %37 = tpu.matmul %36, %34, %cst_26 {dimension_numbers = #tpu.dot_dimension_numbers<[1], [0], [0], [1], [0, 0, 1, 1], [], []>} : vector<64x32xbf16>, vector<32x32xbf16>, vector<64x32xf32> -> vector<64x32xf32>
      %38 = vector.broadcast %35 : vector<1x32xf32> to vector<64x32xf32>
      %39 = arith.addf %37, %38 : vector<64x32xf32>
      %40 = arith.truncf %39 : vector<64x32xf32> to vector<64x32xbf16>
      %c0_27 = arith.constant 0 : index
      %c0_28 = arith.constant 0 : index
      %41 = vector.load %arg7[%c0_27, %c0_28] : memref<32x128xf32, #tpu.memory_space<vmem>>, vector<32x128xf32>
      %42 = arith.truncf %41 : vector<32x128xf32> to vector<32x128xbf16>
      %cst_29 = arith.constant dense<0.000000e+00> : vector<64x128xf32>
      %43 = tpu.matmul %40, %42, %cst_29 {dimension_numbers = #tpu.dot_dimension_numbers<[1], [0], [0], [1], [0, 0, 1, 1], [], []>} : vector<64x32xbf16>, vector<32x128xbf16>, vector<64x128xf32> -> vector<64x128xf32>
      %c0_30 = arith.constant 0 : index
      %c0_31 = arith.constant 0 : index
      %44 = vector.load %arg8[%c0_30, %c0_31] : memref<64x128xf32, #tpu.memory_space<vmem>>, vector<64x128xf32>
      tpu.vector_store %arg8[%c0_30, %c0_31], %43 {strides = array<i32>} : memref<64x128xf32, #tpu.memory_space<vmem>>, vector<64x128xf32>,
    } else {
    }
    return
  }
  func.func @transform_0(%arg0: i32) -> (i32, i32) {
    %c0_i32 = arith.constant 0 : i32
    %c0_i32_0 = arith.constant 0 : i32
    return %arg0, %c0_i32 : i32, i32
  }
  func.func @transform_1(%arg0: i32) -> (i32, i32) {
    %c0_i32 = arith.constant 0 : i32
    %c0_i32_0 = arith.constant 0 : i32
    return %arg0, %c0_i32 : i32, i32
  }
  func.func @transform_2(%arg0: i32) -> (i32, i32) {
    %c0_i32 = arith.constant 0 : i32
    %c0_i32_0 = arith.constant 0 : i32
    return %c0_i32, %arg0 : i32, i32
  }
  func.func @transform_3(%arg0: i32) -> (i32, i32) {
    %c0_i32 = arith.constant 0 : i32
    %c0_i32_0 = arith.constant 0 : i32
    %c0_i32_1 = arith.constant 0 : i32
    return %c0_i32, %c0_i32_0 : i32, i32
  }
  func.func @transform_4(%arg0: i32) -> (i32, i32, i32) {
    %c0_i32 = arith.constant 0 : i32
    %c0_i32_0 = arith.constant 0 : i32
    %c0_i32_1 = arith.constant 0 : i32
    %c0_i32_2 = arith.constant 0 : i32
    return %c0_i32, %c0_i32_0, %c0_i32_1 : i32, i32, i32
  }
  func.func @transform_5(%arg0: i32) -> (i32, i32) {
    %c0_i32 = arith.constant 0 : i32
    %c0_i32_0 = arith.constant 0 : i32
    %c0_i32_1 = arith.constant 0 : i32
    return %c0_i32, %c0_i32_0 : i32, i32
  }
  func.func @transform_6(%arg0: i32) -> (i32, i32) {
    %c0_i32 = arith.constant 0 : i32
    %c0_i32_0 = arith.constant 0 : i32
    %c0_i32_1 = arith.constant 0 : i32
    return %c0_i32, %c0_i32_0 : i32, i32
  }
  func.func @transform_7(%arg0: i32) -> (i32, i32) {
    %c0_i32 = arith.constant 0 : i32
    %c0_i32_0 = arith.constant 0 : i32
    %c0_i32_1 = arith.constant 0 : i32
    return %c0_i32, %c0_i32_0 : i32, i32
  }
}

</mosaic_0001>

<bundles_post_ra>
// kernel: tpu_custom_call.1
= control target key start
LH: loop header
LB: loop body
LE: loop exit
PB: predicated region body
PF: predicated region fallthrough
CT: control target
= control target key end

     0   :  { %12 = vsyncpa [#allocation4], 0  ;;  %s1014_s24 = smov 0   ;;  %s1176_s0 = inlined_call_operand.vmem [shape: f32[256,8], index: 0, kind: input, shape index: {}]   ;;  %s1177_s1 = inlined_call_operand.vmem [shape: f32[256,32], index: 1, kind: input, shape index: {}]   ;;  %s1178_s2 = inlined_call_operand.vmem [shape: s32[1,256], index: 2, kind: input, shape index: {}]   ;;  %s1179_s3 = inlined_call_operand.vmem [shape: f32[8,32], index: 3, kind: input, shape index: {}]   ;;  %s1180_s4 = inlined_call_operand.vmem [shape: f32[2,32,32], index: 4, kind: input, shape index: {}]   ;;  %s1181_s5 = inlined_call_operand.vmem [shape: f32[2,32], index: 5, kind: input, shape index: {}]   ;;  %s1182_s6 = inlined_call_operand.vmem [shape: f32[32,128], index: 6, kind: input, shape index: {}]   ;;  %s1183_s7 = inlined_call_operand.hbm [shape: f32[64,128], index: 7, kind: output, shape index: {}]  }
   0x1 LB: > { %s1020_s25 = sadd.s32 4294967295, %s967_s24   ;;  %p833_p0 = scmp.ge.s32.totalorder %s967_s24, 1  ;;  %s967_s24 = sphi %s1014_s24, %s18_s24  }
   0x2   : > { %p253_p1 = scmp.lt.s32.totalorder %s967_s24, 3 }
   0x4   : > { %p254_p2 = pnand %p833_p0, %p253_p1 }
   0x5   : > { %s834_s26 = sshll.u32 (!%p254_p2), %s1020_s25, 4  ;;  %p300_p3 = scmp.lt.s32.totalorder (!%p254_p2), %s1020_s25, 1 }
   0x6   : > { %257 = sbr.rel (%p254_p2) target bundleno = 905 (0x389), region = 48  ;;  %p289_p4 = scmp.lt.s32.totalorder (!%p254_p2), %s834_s26, 31 }
   0x7   : > { %p838_p5 = scmp.ne.s32.totalorder (!%p254_p2), %s1020_s25, 0 }
   0xb   : > { %s1027_s27 = scalar_select %p300_p3, %s1020_s25, 1 }
   0xc   : > { %s1185_s26 = smov (!%p289_p4, %s834_s26), 31  ;;  %307 = sbr.rel (%p838_p5) target bundleno = 26 (0x1a), region = 52 }
   0xd   : > { %s302_s30 = scalar_lea.vmem %s1178_s2, %s1027_s27  ;;  %s835_s8 = sshll.u32 %s1185_s26, 3 }
   0xe   : > { %s1036_s11 = scalar_lea.vmem %s1176_s0, %s835_s8  ;;  %s1041_s14 = scalar_lea.vmem %s1177_s1, %s835_s8 }
  0x11   : > { %vm308_vm0 = vcmask 261120   ;;  %v969_v0 = vmov 0.0  }
  0x12   : > { %309 = vst.msk [vmem:[#allocation2] sm:$0xff] %vm308_vm0, %v969_v0 }
  0x13   : > { %310 = vst.msk [vmem:[#allocation2 + $0x8] sm:$0xff] %vm308_vm0, %v969_v0 }
  0x14   : > { %311 = vst.msk [vmem:[#allocation2 + $0x10] sm:$0xff] %vm308_vm0, %v969_v0 }
  0x15   : > { %312 = vst.msk [vmem:[#allocation2 + $0x18] sm:$0xff] %vm308_vm0, %v969_v0 }
  0x16   : > { %313 = vst.msk [vmem:[#allocation2 + $0x20] sm:$0xff] %vm308_vm0, %v969_v0 }
  0x17   : > { %314 = vst.msk [vmem:[#allocation2 + $0x28] sm:$0xff] %vm308_vm0, %v969_v0 }
  0x18   : > { %315 = vst.msk [vmem:[#allocation2 + $0x30] sm:$0xff] %vm308_vm0, %v969_v0 }
  0x19   : > { %316 = vst.msk [vmem:[#allocation2 + $0x38] sm:$0xff] %vm308_vm0, %v969_v0 }
  0x1a PF: > { %v333_v1 = vld [vmem:[%s1179_s3] sm:$0xff]  ;;  %vm334_vm1 = vcmask 64512   ;;  %v324_v3 = vld [vmem:[%s1036_s11 + $0x38] sm:$0xff]  ;;  %v318_v4 = vld [vmem:[%s1036_s11 + $0x8] sm:$0xff]  ;;  %v480_v60 = vlaneseq  ;;  %vm572_vm14 = vcmask 261120   ;;  %p871_p6 = scmp.ne.s32.totalorder %s1020_s25, 1 }
  0x1b   : > { %v317_v2 = vld [vmem:[%s1036_s11] sm:$0xff]  ;;  %398 = vmatpush.msra.mxu0 %v333_v1  ;;  %892 = vmatpush.msra.mxu2 %v333_v1  ;;  %v319_v6 = vld [vmem:[%s1036_s11 + $0x10] sm:$0xff]  ;;  %v326_v7 = vld [vmem:[%s1036_s11 + $0x48] sm:$0xff] }
  0x1c   : > { %839 = vmatmul.msk.f32.vlgmr.msra.gmra.mxu0 %vm334_vm1, %v317_v2  ;;  %846 = vmatmul.msk.f32.vlgmr.msra.gmra.mxu2 %vm334_vm1, %v324_v3  ;;  %v325_v5 = vld [vmem:[%s1036_s11 + $0x40] sm:$0xff]  ;;  %v320_v8 = vld [vmem:[%s1036_s11 + $0x18] sm:$0xff]  ;;  %v327_v9 = vld [vmem:[%s1036_s11 + $0x50] sm:$0xff]  ;;  %v481_v2 = vshrl.u32 %v480_v60, 7 }
  0x1d   : > { %v321_v10 = vld [vmem:[%s1036_s11 + $0x20] sm:$0xff]  ;;  %v328_v11 = vld [vmem:[%s1036_s11 + $0x58] sm:$0xff]  ;;  %v322_v12 = vld [vmem:[%s1036_s11 + $0x28] sm:$0xff] }
  0x1e   : > { %v329_v13 = vld [vmem:[%s1036_s11 + $0x60] sm:$0xff]  ;;  %v323_v14 = vld [vmem:[%s1036_s11 + $0x30] sm:$0xff]  ;;  %v330_v15 = vld [vmem:[%s1036_s11 + $0x68] sm:$0xff] }
  0x1f   : > { %v331_v16 = vld [vmem:[%s1036_s11 + $0x70] sm:$0xff]  ;;  %v332_v17 = vld [vmem:[%s1036_s11 + $0x78] sm:$0xff]  ;;  %v461_v33 = vld [vmem:[%s1041_s14 + $0x68] sm:$0xff] }
  0x20   : > { %v462_v31 = vld [vmem:[%s1041_s14 + $0x70] sm:$0xff]  ;;  %v463_v32 = vld [vmem:[%s1041_s14 + $0x78] sm:$0xff]  ;;  %v460_v38 = vld [vmem:[%s1041_s14 + $0x60] sm:$0xff] }
  0x21   : > { %v459_v41 = vld [vmem:[%s1041_s14 + $0x58] sm:$0xff]  ;;  %v458_v43 = vld [vmem:[%s1041_s14 + $0x50] sm:$0xff]  ;;  %v457_v46 = vld [vmem:[%s1041_s14 + $0x48] sm:$0xff] }
  0x22   : > { %v456_v48 = vld [vmem:[%s1041_s14 + $0x40] sm:$0xff]  ;;  %v454_v52 = vld [vmem:[%s1041_s14 + $0x30] sm:$0xff]  ;;  %v455_v54 = vld [vmem:[%s1041_s14 + $0x38] sm:$0xff] }
  0x23   : > { %v452_v57 = vld [vmem:[%s1041_s14 + $0x20] sm:$0xff]  ;;  %v453_v58 = vld [vmem:[%s1041_s14 + $0x28] sm:$0xff]  ;;  %v450_v0 = vld [vmem:[%s1041_s14 + $0x10] sm:$0xff] }
  0x24   : > { %840 = vmatmul.msk.f32.gmra.mxu0 %vm334_vm1, %v318_v4  ;;  %847 = vmatmul.msk.f32.gmra.mxu2 %vm334_vm1, %v325_v5  ;;  %v451_v1 = vld [vmem:[%s1041_s14 + $0x18] sm:$0xff] }
  0x2c   : > { %841 = vmatmul.msk.f32.gmra.mxu0 %vm334_vm1, %v319_v6  ;;  %848 = vmatmul.msk.f32.gmra.mxu2 %vm334_vm1, %v326_v7  ;;  %v448_v6 = vld [vmem:[%s1041_s14] sm:$0xff]  ;;  %v449_v7 = vld [vmem:[%s1041_s14 + $0x8] sm:$0xff] }
  0x34   : > { %842 = vmatmul.msk.f32.gmra.mxu0 %vm334_vm1, %v320_v8  ;;  %849 = vmatmul.msk.f32.gmra.mxu2 %vm334_vm1, %v327_v9  ;;  %v483_v8 = vadd.s32 16, %v481_v2  ;;  %v484_v9 = vadd.s32 24, %v481_v2 }
  0x3c   : > { %843 = vmatmul.msk.f32.gmra.mxu0 %vm334_vm1, %v321_v10  ;;  %850 = vmatmul.msk.f32.gmra.mxu2 %vm334_vm1, %v328_v11  ;;  %v926_v10 = vld [vmem:[%s302_s30] ss:$0 sm:$0xff]  ;;  %v482_v11 = vadd.s32 8, %v481_v2 }
  0x3d   : > { %vm493_vm2 = vcmp.eq.s32.totalorder %v483_v8, %v926_v10  ;;  %vm494_vm3 = vcmp.eq.s32.totalorder %v484_v9, %v926_v10  ;;  %vm491_vm4 = vcmp.eq.s32.totalorder %v481_v2, %v926_v10 }
  0x3e   : > { %vm492_vm5 = vcmp.eq.s32.totalorder %v482_v11, %v926_v10  ;;  %vm865_vm6 = vmpackc.low %vm494_vm3, %vm493_vm2 }
  0x3f   : > { %vm863_vm7 = vmpackc.low %vm492_vm5, %vm491_vm4 }
  0x44   : > { %844 = vmatmul.msk.f32.gmra.mxu0 %vm334_vm1, %v322_v12  ;;  %851 = vmatmul.msk.f32.gmra.mxu2 %vm334_vm1, %v329_v13 }
  0x4c   : > { %845 = vmatmul.msk.f32.gmra.mxu0 %vm334_vm1, %v323_v14  ;;  %852 = vmatmul.msk.f32.gmra.mxu2 %vm334_vm1, %v330_v15 }
  0x54   : > { %853 = vmatmul.msk.f32.gmra.mxu2 %vm334_vm1, %v331_v16  ;;  %v970_v16 = vmov 1.0|1.0  }
  0x5c   : > { %854 = vmatmul.msk.f32.gmra.mxu2 %vm334_vm1, %v332_v17  ;;  %v485_v17 = vadd.s32 32, %v481_v2 }
  0x5e   : > { %vm495_vm8 = vcmp.eq.s32.totalorder %v485_v17, %v926_v10 }
  0x99   : > { %v1079_v20 = vpop.f32.mrf.mxu0 }
  0x9a   : > { %v464_v12 = vmul.f32 %v448_v6, %v1079_v20  ;;  %v488_v20 = vadd.s32 56, %v481_v2 }
  0x9c   : > { %vm498_vm12 = vcmp.eq.s32.totalorder %v488_v20, %v926_v10 }
  0x9f   : > { %v421_v18 = vpop.f32.mrf.mxu2 }
  0xa0   : > { %v471_v59 = vmul.f32 %v455_v54, %v421_v18  ;;  %v486_v18 = vadd.s32 40, %v481_v2 }
  0xa1   : > { %v1081_v23 = vpop.f32.mrf.mxu0 }
  0xa2   : > { %v465_v13 = vmul.f32 %v449_v7, %v1081_v23  ;;  %vm496_vm9 = vcmp.eq.s32.totalorder %v486_v18, %v926_v10 }
  0xa3   : > { %vm867_vm10 = vmpackc.low %vm496_vm9, %vm495_vm8 }
  0xa4   : > { %v527_v15 = vpack.c.bf16 %v465_v13, %v464_v12 }
  0xa7   : > { %v424_v19 = vpop.f32.mrf.mxu2 }
  0xa8   : > { %v472_v53 = vmul.f32 %v456_v48, %v424_v19  ;;  %v487_v19 = vadd.s32 48, %v481_v2 }
  0xa9   : > { %v406_v25 = vpop.f32.mrf.mxu0 }
  0xaa   : > { %v466_v3 = vmul.f32 %v450_v0, %v406_v25  ;;  %vm497_vm11 = vcmp.eq.s32.totalorder %v487_v19, %v926_v10 }
  0xab   : > { %vm869_vm13 = vmpackc.low %vm498_vm12, %vm497_vm11 }
  0xaf   : > { %v427_v21 = vpop.f32.mrf.mxu2 }
  0xb0   : > { %v473_v49 = vmul.f32 %v457_v46, %v427_v21  ;;  %v519_v21 = vld [vmem:[#allocation2] sm:$0xff] }
  0xb1   : > { %v409_v27 = vpop.f32.mrf.mxu0 }
  0xb2   : > { %v531_v56 = vpack.c.bf16 %v473_v49, %v472_v53  ;;  %v467_v4 = vmul.f32 %v451_v1, %v409_v27 }
  0xb4   : > { %v528_v14 = vpack.c.bf16 %v467_v4, %v466_v3 }
  0xb7   : > { %v430_v22 = vpop.f32.mrf.mxu2 }
  0xb8   : > { %v474_v47 = vmul.f32 %v458_v43, %v430_v22 }
  0xb9   : > { %v412_v29 = vpop.f32.mrf.mxu0 }
  0xba   : > { %v468_v61 = vmul.f32 %v452_v57, %v412_v29 }
  0xbf   : > { %v433_v24 = vpop.f32.mrf.mxu2 }
  0xc0   : > { %v475_v44 = vmul.f32 %v459_v41, %v433_v24  ;;  %v521_v24 = vld [vmem:[#allocation2 + $0x10] sm:$0xff] }
  0xc1   : > { %v415_v37 = vpop.f32.mrf.mxu0 }
  0xc2   : > { %v532_v50 = vpack.c.bf16 %v475_v44, %v474_v47  ;;  %v469_v62 = vmul.f32 %v453_v58, %v415_v37 }
  0xc4   : > { %v529_v5 = vpack.c.bf16 %v469_v62, %v468_v61 }
  0xc7   : > { %v436_v26 = vpop.f32.mrf.mxu2 }
  0xc8   : > { %v476_v42 = vmul.f32 %v460_v38, %v436_v26  ;;  %v520_v26 = vld [vmem:[#allocation2 + $0x8] sm:$0xff] }
  0xc9   : > { %v418_v51 = vpop.f32.mrf.mxu0 }
  0xca   : > { %v470_v55 = vmul.f32 %v454_v52, %v418_v51 }
  0xcc   : > { %v530_v63 = vpack.c.bf16 %v471_v59, %v470_v55 }
  0xcf   : > { %v439_v28 = vpop.f32.mrf.mxu2 }
  0xd0   : > { %v477_v39 = vmul.f32 %v461_v33, %v439_v28  ;;  %v523_v33 = vld [vmem:[#allocation2 + $0x20] sm:$0xff] }
  0xd2   : > { %v533_v45 = vpack.c.bf16 %v477_v39, %v476_v42  ;;  %v525_v39 = vld [vmem:[#allocation2 + $0x30] sm:$0xff]  ;;  %v526_v42 = vld [vmem:[#allocation2 + $0x38] sm:$0xff] }
  0xd7   : > { %v442_v30 = vpop.f32.mrf.mxu2 }
  0xd8   : > { %v478_v35 = vmul.f32 %v462_v31, %v442_v30  ;;  %v522_v30 = vld [vmem:[#allocation2 + $0x18] sm:$0xff] }
  0xdf   : > { %v445_v34 = vpop.f32.mrf.mxu2 }
  0xe0   : > { %v479_v36 = vmul.f32 %v463_v32, %v445_v34 }
  0xe2   : > { %v534_v40 = vpack.c.bf16 %v479_v36, %v478_v35  ;;  %v524_v36 = vld [vmem:[#allocation2 + $0x28] sm:$0xff] }
  0xe4   : > { %535 = vmatpush.bf16.msra.mxu1 %v534_v40  ;;  %893 = vmatpush.bf16.msra.mxu3 %v534_v40 }
  0xe8   : > { %536 = vmatpush.bf16.msra.mxu1 %v533_v45  ;;  %894 = vmatpush.bf16.msra.mxu3 %v533_v45 }
  0xec   : > { %537 = vmatpush.bf16.msra.mxu1 %v532_v50  ;;  %895 = vmatpush.bf16.msra.mxu3 %v532_v50 }
  0xf0   : > { %538 = vmatpush.bf16.msra.mxu1 %v531_v56  ;;  %896 = vmatpush.bf16.msra.mxu3 %v531_v56 }
  0xf4   : > { %539 = vmatpush.bf16.msra.mxu1 %v530_v63  ;;  %897 = vmatpush.bf16.msra.mxu3 %v530_v63 }
  0xf8   : > { %540 = vmatpush.bf16.msra.mxu1 %v529_v5  ;;  %898 = vmatpush.bf16.msra.mxu3 %v529_v5 }
  0xfc   : > { %541 = vmatpush.bf16.msra.mxu1 %v528_v14  ;;  %899 = vmatpush.bf16.msra.mxu3 %v528_v14 }
 0x100   : > { %542 = vmatpush.bf16.msra.mxu1 %v527_v15  ;;  %900 = vmatpush.bf16.msra.mxu3 %v527_v15 }
 0x103   : > { %866 = vmatmul.msk.bf16.vlgmr.msra.gmra.mxu3 %vm865_vm6, %v970_v16  ;;  %864 = vmatmul.msk.bf16.vlgmr.msra.gmra.mxu1 %vm863_vm7, %v970_v16 }
 0x113   : > { %868 = vmatmul.msk.bf16.gmra.mxu3 %vm867_vm10, %v970_v16 }
 0x123   : > { %870 = vmatmul.msk.bf16.gmra.mxu3 %vm869_vm13, %v970_v16 }
 0x180   : > { %v544_v22 = vpop.f32.mrf.mxu1 }
 0x181   : > { %v564_v23 = vadd.f32 %v544_v22, %v519_v21 }
 0x183   : > { %573 = vst.msk [vmem:[#allocation2] sm:$0xff] %vm572_vm14, %v564_v23 }
 0x186   : > { %v549_v25 = vpop.f32.mrf.mxu3 }
 0x187   : > { %v566_v27 = vadd.f32 %v549_v25, %v521_v24 }
 0x188   : > { %v546_v28 = vpop.f32.mrf.mxu1 }
 0x189   : > { %575 = vst.msk [vmem:[#allocation2 + $0x10] sm:$0xff] %vm572_vm14, %v566_v27  ;;  %v565_v29 = vadd.f32 %v546_v28, %v520_v26 }
 0x18b   : > { %574 = vst.msk [vmem:[#allocation2 + $0x8] sm:$0xff] %vm572_vm14, %v565_v29 }
 0x18e   : > { %v551_v31 = vpop.f32.mrf.mxu3 }
 0x18f   : > { %v567_v32 = vadd.f32 %v551_v31, %v522_v30 }
 0x191   : > { %576 = vst.msk [vmem:[#allocation2 + $0x18] sm:$0xff] %vm572_vm14, %v567_v32 }
 0x196   : > { %v554_v34 = vpop.f32.mrf.mxu3 }
 0x197   : > { %v568_v35 = vadd.f32 %v554_v34, %v523_v33 }
 0x199   : > { %577 = vst.msk [vmem:[#allocation2 + $0x20] sm:$0xff] %vm572_vm14, %v568_v35 }
 0x19e   : > { %v556_v37 = vpop.f32.mrf.mxu3 }
 0x19f   : > { %v569_v38 = vadd.f32 %v556_v37, %v524_v36 }
 0x1a1   : > { %578 = vst.msk [vmem:[#allocation2 + $0x28] sm:$0xff] %vm572_vm14, %v569_v38 }
 0x1a6   : > { %v559_v40 = vpop.f32.mrf.mxu3 }
 0x1a7   : > { %v570_v41 = vadd.f32 %v559_v40, %v525_v39 }
 0x1a9   : > { %579 = vst.msk [vmem:[#allocation2 + $0x30] sm:$0xff] %vm572_vm14, %v570_v41 }
 0x1ad   : > { %584 = sbr.rel (%p871_p6) target bundleno = 899 (0x383), region = 56 }
 0x1ae   : > { %v561_v43 = vpop.f32.mrf.mxu3 }
 0x1af   : > { %v571_v44 = vadd.f32 %v561_v43, %v526_v42 }
 0x1b1   : > { %580 = vst.msk [vmem:[#allocation2 + $0x38] sm:$0xff] %vm572_vm14, %v571_v44 }
 0x1b2   : > { %v595_v45 = vld [vmem:[%s1180_s4 + $0x10] sm:$0xff]  ;;  %v596_v46 = vld [vmem:[%s1180_s4 + $0x18] sm:$0xff]  ;;  %v593_v47 = vld [vmem:[%s1180_s4] sm:$0xff] }
 0x1b3   : > { %v598_v48 = vpack.c.bf16 %v596_v46, %v595_v45  ;;  %v594_v49 = vld [vmem:[%s1180_s4 + $0x8] sm:$0xff]  ;;  %v587_v50 = vld [vmem:[#allocation2 + $0x10] sm:$0xff]  ;;  %v588_v52 = vld [vmem:[#allocation2 + $0x18] sm:$0xff] }
 0x1b4   : > { %v597_v51 = vpack.c.bf16 %v594_v49, %v593_v47  ;;  %v585_v53 = vld [vmem:[#allocation2] sm:$0xff]  ;;  %v586_v54 = vld [vmem:[#allocation2 + $0x8] sm:$0xff]  ;;  %v601_v55 = vpack.c.bf16 %v588_v52, %v587_v50  ;;  %v591_v60 = vld [vmem:[#allocation2 + $0x30] sm:$0xff] }
 0x1b5   : > { %901 = vmatpush.bf16.msra.mxu3 %v598_v48  ;;  %623 = vmatpush.bf16.msra.mxu0 %v598_v48  ;;  %v600_v56 = vpack.c.bf16 %v586_v54, %v585_v53  ;;  %v589_v57 = vld [vmem:[#allocation2 + $0x20] sm:$0xff]  ;;  %v590_v58 = vld [vmem:[#allocation2 + $0x28] sm:$0xff]  ;;  %v878_v63 = vld [vmem:[%s1180_s4 + $0x30] sm:$0xff] }
 0x1b6   : > { %v602_v59 = vpack.c.bf16 %v590_v58, %v589_v57  ;;  %v879_v0 = vld [vmem:[%s1180_s4 + $0x38] sm:$0xff]  ;;  %v876_v2 = vld [vmem:[%s1180_s4 + $0x20] sm:$0xff]  ;;  %v877_v3 = vld [vmem:[%s1180_s4 + $0x28] sm:$0xff] }
 0x1b7   : > { %v652_v1 = vpack.c.bf16 %v879_v0, %v878_v63  ;;  %v651_v4 = vpack.c.bf16 %v877_v3, %v876_v2  ;;  %v927_v6 = vld [vmem:[%s1181_s5] ss:$0 sm:$0xff]  ;;  %v706_v26 = vld [vmem:[%s1182_s6 + $0x10] sm:$0xff]  ;;  %v707_v27 = vld [vmem:[%s1182_s6 + $0x18] sm:$0xff] }
 0x1b8   : > { %v592_v61 = vld [vmem:[#allocation2 + $0x38] sm:$0xff]  ;;  %v709_v28 = vpack.c.bf16 %v707_v27, %v706_v26  ;;  %v704_v29 = vld [vmem:[%s1182_s6] sm:$0xff]  ;;  %v705_v30 = vld [vmem:[%s1182_s6 + $0x8] sm:$0xff] }
 0x1b9   : > { %902 = vmatpush.bf16.msra.mxu3 %v597_v51  ;;  %624 = vmatpush.bf16.msra.mxu0 %v597_v51  ;;  %v603_v62 = vpack.c.bf16 %v592_v61, %v591_v60  ;;  %v708_v31 = vpack.c.bf16 %v705_v30, %v704_v29  ;;  %v928_v33 = vld [vmem:[%s1181_s5 + $0x1] ss:$0 sm:$0xff] }
 0x1ba   : > { %903 = vmatpush.bf16.msra.mxu1 %v652_v1  ;;  %905 = vmatpush.bf16.msra.mxu2 %v709_v28 }
 0x1bc   : > { %873 = vmatmul.msk.bf16.vlgmr.msra.gmra.mxu3 %vm572_vm14, %v601_v55  ;;  %872 = vmatmul.msk.bf16.vlgmr.msra.gmra.mxu0 %vm572_vm14, %v600_v56 }
 0x1bd   : > { %677 = vmatpush.bf16.msrb.mxu0 %v652_v1 }
 0x1be   : > { %904 = vmatpush.bf16.msra.mxu1 %v651_v4  ;;  %906 = vmatpush.bf16.msra.mxu2 %v708_v31 }
 0x1c1   : > { %678 = vmatpush.bf16.msrb.mxu0 %v651_v4 }
 0x1c5   : > { %728 = vmatpush.bf16.msra.mxu0 %v709_v28 }
 0x1c9   : > { %729 = vmatpush.bf16.msra.mxu0 %v708_v31 }
 0x1cc   : > { %874 = vmatmul.msk.bf16.gmra.mxu3 %vm572_vm14, %v602_v59 }
 0x1dc   : > { %875 = vmatmul.msk.bf16.gmra.mxu3 %vm572_vm14, %v603_v62 }
 0x239   : > { %v626_v5 = vpop.f32.mrf.mxu0 }
 0x23a   : > { %v627_v8 = vadd.f32 %v927_v6, %v626_v5 }
 0x23f   : > { %v631_v7 = vpop.f32.mrf.mxu3 }
 0x240   : > { %v632_v13 = vadd.f32 %v927_v6, %v631_v7 }
 0x241   : > { %v628_v9 = vpop.f32.mrf.mxu0 }
 0x242   : > { %v629_v10 = vadd.f32 %v927_v6, %v628_v9 }
 0x244   : > { %v654_v11 = vpack.c.bf16 %v629_v10, %v627_v8 }
 0x246   : > { %880 = vmatmul.msk.bf16.vlgmr.msrb.gmra.mxu0 %vm572_vm14, %v654_v11 }
 0x247   : > { %v633_v12 = vpop.f32.mrf.mxu3 }
 0x248   : > { %v634_v14 = vadd.f32 %v927_v6, %v633_v12 }
 0x24a   : > { %v655_v15 = vpack.c.bf16 %v634_v14, %v632_v13 }
 0x24c   : > { %881 = vmatmul.msk.bf16.vlgmr.msra.gmra.mxu1 %vm572_vm14, %v655_v15 }
 0x24f   : > { %v636_v16 = vpop.f32.mrf.mxu3 }
 0x250   : > { %v637_v18 = vadd.f32 %v927_v6, %v636_v16 }
 0x257   : > { %v638_v17 = vpop.f32.mrf.mxu3 }
 0x258   : > { %v639_v19 = vadd.f32 %v927_v6, %v638_v17 }
 0x25a   : > { %v656_v20 = vpack.c.bf16 %v639_v19, %v637_v18 }
 0x25c   : > { %882 = vmatmul.msk.bf16.gmra.mxu1 %vm572_vm14, %v656_v20 }
 0x25f   : > { %v641_v21 = vpop.f32.mrf.mxu3 }
 0x260   : > { %v642_v23 = vadd.f32 %v927_v6, %v641_v21 }
 0x267   : > { %v643_v22 = vpop.f32.mrf.mxu3 }
 0x268   : > { %v644_v24 = vadd.f32 %v927_v6, %v643_v22 }
 0x26a   : > { %v657_v25 = vpack.c.bf16 %v644_v24, %v642_v23 }
 0x26c   : > { %883 = vmatmul.msk.bf16.gmra.mxu1 %vm572_vm14, %v657_v25 }
 0x2c3   : > { %v680_v32 = vpop.f32.mrf.mxu0 }
 0x2c4   : > { %v681_v35 = vadd.f32 %v928_v33, %v680_v32 }
 0x2c9   : > { %v685_v34 = vpop.f32.mrf.mxu1 }
 0x2ca   : > { %v686_v40 = vadd.f32 %v928_v33, %v685_v34 }
 0x2cb   : > { %v682_v36 = vpop.f32.mrf.mxu0 }
 0x2cc   : > { %v683_v37 = vadd.f32 %v928_v33, %v682_v36 }
 0x2ce   : > { %v700_v38 = vpack.c.bf16 %v683_v37, %v681_v35 }
 0x2d0   : > { %884 = vmatmul.msk.bf16.vlgmr.msra.gmra.mxu0 %vm572_vm14, %v700_v38 }
 0x2d1   : > { %v687_v39 = vpop.f32.mrf.mxu1 }
 0x2d2   : > { %v688_v41 = vadd.f32 %v928_v33, %v687_v39 }
 0x2d4   : > { %v701_v42 = vpack.c.bf16 %v688_v41, %v686_v40 }
 0x2d6   : > { %885 = vmatmul.msk.bf16.vlgmr.msra.gmra.mxu2 %vm572_vm14, %v701_v42 }
 0x2d9   : > { %v690_v43 = vpop.f32.mrf.mxu1 }
 0x2da   : > { %v691_v45 = vadd.f32 %v928_v33, %v690_v43 }
 0x2e1   : > { %v692_v44 = vpop.f32.mrf.mxu1 }
 0x2e2   : > { %v693_v46 = vadd.f32 %v928_v33, %v692_v44 }
 0x2e4   : > { %v702_v47 = vpack.c.bf16 %v693_v46, %v691_v45 }
 0x2e6   : > { %886 = vmatmul.msk.bf16.gmra.mxu2 %vm572_vm14, %v702_v47 }
 0x2e9   : > { %v695_v48 = vpop.f32.mrf.mxu1 }
 0x2ea   : > { %v696_v50 = vadd.f32 %v928_v33, %v695_v48 }
 0x2f1   : > { %v697_v49 = vpop.f32.mrf.mxu1 }
 0x2f2   : > { %v698_v51 = vadd.f32 %v928_v33, %v697_v49 }
 0x2f4   : > { %v703_v52 = vpack.c.bf16 %v698_v51, %v696_v50 }
 0x2f6   : > { %887 = vmatmul.msk.bf16.gmra.mxu2 %vm572_vm14, %v703_v52 }
 0x34d   : > { %v731_v53 = vpop.f32.mrf.mxu0 }
 0x34e   : > { %751 = vst [vmem:[#allocation3] sm:$0xff] %v731_v53 }
 0x355   : > { %v733_v54 = vpop.f32.mrf.mxu0 }
 0x356   : > { %752 = vst [vmem:[#allocation3 + $0x8] sm:$0xff] %v733_v54 }
 0x359   : > { %v736_v55 = vpop.f32.mrf.mxu2 }
 0x35a   : > { %753 = vst [vmem:[#allocation3 + $0x10] sm:$0xff] %v736_v55 }
 0x361   : > { %v738_v56 = vpop.f32.mrf.mxu2 }
 0x362   : > { %754 = vst [vmem:[#allocation3 + $0x18] sm:$0xff] %v738_v56 }
 0x369   : > { %v741_v57 = vpop.f32.mrf.mxu2 }
 0x36a   : > { %755 = vst [vmem:[#allocation3 + $0x20] sm:$0xff] %v741_v57 }
 0x371   : > { %v743_v58 = vpop.f32.mrf.mxu2 }
 0x372   : > { %756 = vst [vmem:[#allocation3 + $0x28] sm:$0xff] %v743_v58 }
 0x379   : > { %v746_v59 = vpop.f32.mrf.mxu2 }
 0x37a   : > { %757 = vst [vmem:[#allocation3 + $0x30] sm:$0xff] %v746_v59 }
 0x381   : > { %v748_v60 = vpop.f32.mrf.mxu2 }
 0x382   : > { %758 = vst [vmem:[#allocation3 + $0x38] sm:$0xff] %v748_v60 }
 0x383 PF: > { %p911_p7 = scmp.eq.s32.totalorder %s1020_s25, 1  ;;  %s971_s28 = smov [#allocation3]  }
 0x384   : > { %s764_s29 = sshll.u32 %s971_s28, 4  ;;  %s766_s9 = sshll.u32 %s1183_s7, 4  ;;  %s765_s29 = int_to_ptr.vmem [resolvable:$true] %s764_s29  ;;  %s767_s9 = int_to_ptr.hbm [resolvable:$true] %s766_s9 }
 0x385   : > { %s972_s10 = smov 128   ;;  %s973_s11 = smov 8  }
 0x386   : > { %908 = dma.vmem_to_hbm [thread:$0]  (%p911_p7), %s765_s29, 1024, %s767_s9, [#allocation4], %s972_s10, %s972_s10, %s973_s11  }
 0x387   : > { %962 = dma.done.wait (%p911_p7), [#allocation4], 1024  }
 0x388   : > { %964 = vsyncadd (%p911_p7), [#allocation4], 4294966272 }
 0x389 PF: > { %s18_s24 = sadd.s32 1, %s967_s24  }
 0x38a   : > { %p15_p8 = scmp.ge.s32.totalorder %s18_s24, 4  }
 0x38c   :  { %17 = sbr.rel (!%p15_p8) target bundleno = 1 (0x1), region = 90 }
 0x391   :  { %783 = vsyncpa [#allocation4], 1 }
 0x392   :  { %785 = vsyncpa [#allocation4 + $0x1], 1 }

</bundles_post_ra>
